<compile_context>
chip_gen: v7x
topology: tpu7x:2x2x1
jax: 0.10.0
libtpu: 0.0.40
codegen_flags: <defaults>
</compile_context>

<pallas_src>
import functools

import numpy as np
import jax
import jax.numpy as jnp
from jax.experimental import pallas as pl
from jax.experimental.pallas import tpu as pltpu


def _round_up(x, m):
    return (x + m - 1) // m * m


def _supcon_kernel(feat_ref, lab_r_ref, slab_r_ref, lab_c_ref, slab_c_ref,
                   out_ref, a_acc_ref, s_acc_ref, csum_ref, rneg_ref, *,
                   tm, n_actual, temperature, base_temperature,
                   tau_plus, n_count, clamp_min):
    r = pl.program_id(0)

    @pl.when(r == 0)
    def _init():
        a_acc_ref[...] = jnp.zeros_like(a_acc_ref)
        s_acc_ref[...] = jnp.zeros_like(s_acc_ref)
        csum_ref[...] = jnp.zeros_like(csum_ref)

    row0 = pl.multiple_of(r * tm, tm)

    feat_all = feat_ref[...]                          # [Np, Dp] (resident)
    feat_rows = feat_ref[pl.ds(row0, tm), :]          # [TM, Dp]

    # anchor_dot_contrast for this row tile (MXU), then row-max subtraction.
    adc = jax.lax.dot_general(feat_rows, feat_all, (((1,), (1,)), ((), ())),
                              preferred_element_type=jnp.float32) / temperature
    n_cols = adc.shape[1]

    col_ids = jax.lax.broadcasted_iota(jnp.int32, (tm, n_cols), 1)
    row_ids = row0 + jax.lax.broadcasted_iota(jnp.int32, (tm, n_cols), 0)
    col_valid = col_ids < n_actual                                        # [TM, Np]
    row_valid = (row0 + jax.lax.broadcasted_iota(jnp.int32, (tm, 1), 0)) < n_actual
    rowv = row_valid.astype(jnp.float32)                                  # [TM, 1]

    row_max = jnp.max(jnp.where(col_valid, adc, -1e30), axis=1, keepdims=True)
    logits = adc - row_max                                                # finite

    # Masks rebuilt in-kernel from the int32 label vectors (cheap VPU compares).
    eq_lab = lab_r_ref[...] == lab_c_ref[...]          # [TM, Np]
    eq_sup = slab_r_ref[...] == slab_c_ref[...]
    off_diag = (row_ids != col_ids) & col_valid        # logits_mask (padded cols dropped)
    mask = (eq_lab & off_diag).astype(jnp.float32)               # positives (no diag)
    sup_full = (eq_sup & col_valid).astype(jnp.float32)          # pre-diag super mask

    # exp(logits) with diagonal / padded columns zeroed; negatives = non-super part.
    exp_nd = jnp.where(off_diag, jnp.exp(logits), 0.0)
    exp_neg = jnp.where(eq_sup, 0.0, exp_nd)           # == exp(logits) * neg_mask

    mls = jnp.sum(mask * logits, axis=1, keepdims=True)        # [TM,1]
    mrs = jnp.sum(mask, axis=1, keepdims=True)                 # [TM,1]
    rneg = jnp.sum(sup_full * logits, axis=1, keepdims=True)   # reweight_neg rows
    den = jnp.sum(exp_neg, axis=1, keepdims=True)              # [TM,1]

    # Guard only padded rows; degenerate *valid* rows keep the torch inf/nan behavior.
    mrs_safe = jnp.where(row_valid, mrs, 1.0)
    den_safe = jnp.where(row_valid, den, 1.0)
    log_den = jnp.log(den_safe)

    # Cross-tile accumulators (kept as (1,1)/(1,Np) VMEM blocks; vector math only).
    a_acc_ref[...] += jnp.sum(rowv * (mls / mrs_safe - log_den), keepdims=True)
    s_acc_ref[...] += jnp.sum(rowv * mls, keepdims=True)   # -> pos_matrix = exp(.)
    csum_ref[...] += jnp.sum(mask * (rowv / mrs_safe), axis=0, keepdims=True)
    rneg_ref[pl.ds(row0, tm), :] = rneg

    @pl.when(r == pl.num_programs(0) - 1)
    def _finalize():
        pos_matrix = jnp.exp(s_acc_ref[...])                              # (1,1)
        ng = (rneg_ref[...] - tau_plus * n_count * pos_matrix) / (1.0 - tau_plus)
        ng = jnp.maximum(ng, clamp_min)                                   # (Np,1)
        # sum_j Ng[j] * c[j]  -- tiny 1 x Np x 1 contraction.
        cross = jax.lax.dot_general(csum_ref[...], ng, (((1,), (0,)), ((), ())),
                                    preferred_element_type=jnp.float32)   # (1,1)
        scale = -(temperature / base_temperature) / n_actual
        out_ref[...] = scale * (a_acc_ref[...] - cross)


def supcon_superclass_distance_loss(features, labels, super_labels, *,
                                    temperature=0.07, base_temperature=None,
                                    beta=1.0, tau_plus=0.1):
    """SupConLoss_SuperClassDistance forward (HCL=True, contrast_mode='all').

    `beta` is kept for API parity only: in the reference forward, imp is [N,1],
    so imp.mean(-1) == imp and the importance weighting cancels exactly.
    """
    del beta
    if base_temperature is None:
        base_temperature = temperature     # the module sets base_temperature = temperature

    bsz, n_views = features.shape[0], features.shape[1]
    feat = features.reshape(bsz, n_views, -1).astype(jnp.float32)
    d = feat.shape[-1]
    n = bsz * n_views

    # contrast_feature = cat(unbind(features, dim=1), dim=0)  -> view-major [N, D]
    contrast = jnp.swapaxes(feat, 0, 1).reshape(n, d)
    lab = jnp.tile(jnp.reshape(labels, (-1,)).astype(jnp.int32), n_views)
    slab = jnp.tile(jnp.reshape(super_labels, (-1,)).astype(jnp.int32), n_views)

    # ---- tiling / padding ----
    dp = _round_up(d, 128)                 # zero-pad feature dim: F F^T unchanged
    if n <= 256:
        tm = _round_up(n, 8)               # single tile for small problems
    else:
        tm = 256                           # v6e/v7x MXU-friendly row tile
        while tm > 8 and 10 * tm * _round_up(n, tm) * 4 > 40 * 2**20:
            tm //= 2                       # bound live [TM,Np] temporaries for VMEM
    n_pad = _round_up(n, tm)
    num_tiles = n_pad // tm
    assert n_pad % tm == 0

    feat_p = jnp.zeros((n_pad, dp), jnp.float32).at[:n, :d].set(contrast)
    lab_p = jnp.full((n_pad,), -1, jnp.int32).at[:n].set(lab)
    slab_p = jnp.full((n_pad,), -1, jnp.int32).at[:n].set(slab)
    lab_row, lab_col = lab_p.reshape(n_pad, 1), lab_p.reshape(1, n_pad)
    slab_row, slab_col = slab_p.reshape(n_pad, 1), slab_p.reshape(1, n_pad)

    n_count = float(bsz * 2 - 2)                              # torch: N = batch_size*2 - 2
    clamp_min = float(n_count * np.e ** (-1.0 / temperature))

    kernel = functools.partial(
        _supcon_kernel,
        tm=tm, n_actual=n,
        temperature=float(temperature),
        base_temperature=float(base_temperature),
        tau_plus=float(tau_plus),
        n_count=n_count, clamp_min=clamp_min)

    # Explicit VMEM budget (capped at 56 MiB so the tiling also fits v7x's 64 MiB).
    est = (2 * n_pad * dp * 4              # resident features (+ double-buffer headroom)
           + 10 * tm * n_pad * 4           # live [TM, Np] temporaries in one grid step
           + 3 * n_pad * 4 + 32 * n_pad)   # scratch + label blocks
    vmem_limit = int(min(56 * 2**20, max(32 * 2**20, int(est * 1.25))))

    out = pl.pallas_call(
        kernel,
        out_shape=jax.ShapeDtypeStruct((1, 1), jnp.float32),
        grid=(num_tiles,),
        in_specs=[
            pl.BlockSpec((n_pad, dp), lambda r: (0, 0)),   # features (resident)
            pl.BlockSpec((tm, 1), lambda r: (r, 0)),       # row labels
            pl.BlockSpec((tm, 1), lambda r: (r, 0)),       # row super labels
            pl.BlockSpec((1, n_pad), lambda r: (0, 0)),    # col labels (resident)
            pl.BlockSpec((1, n_pad), lambda r: (0, 0)),    # col super labels (resident)
        ],
        out_specs=pl.BlockSpec((1, 1), lambda r: (0, 0)),
        scratch_shapes=[
            pltpu.VMEM((1, 1), jnp.float32),       # sum_i (mls/mrs - log_den)
            pltpu.VMEM((1, 1), jnp.float32),       # sum_i mls  -> pos_matrix
            pltpu.VMEM((1, n_pad), jnp.float32),   # c[j] = sum_i mask[i,j]/mrs[i]
            pltpu.VMEM((n_pad, 1), jnp.float32),   # reweight_neg per row (Ng input)
        ],
        compiler_params=pltpu.CompilerParams(
            dimension_semantics=("arbitrary",),    # cross-tile scratch accumulation
            vmem_limit_bytes=vmem_limit),
    )(feat_p, lab_row, slab_row, lab_col, slab_col)
    return out[0, 0]


def _reference_loss(features, labels, super_labels, *,
                    temperature=0.07, beta=1.0, tau_plus=0.1):
    """Pure-JAX line-by-line transcription of the torch forward (HCL=True)."""
    bsz, n_views = features.shape[0], features.shape[1]
    feat = features.reshape(bsz, n_views, -1).astype(jnp.float32)
    contrast_feature = jnp.concatenate([feat[:, v, :] for v in range(n_views)], axis=0)
    anchor_feature = contrast_feature
    mask = (labels[:, None] == labels[None, :]).astype(jnp.float32)
    super_mask = (super_labels[:, None] == super_labels[None, :]).astype(jnp.float32)
    adc = (anchor_feature @ contrast_feature.T) / temperature
    logits = adc - jnp.max(adc, axis=1, keepdims=True)
    mask = jnp.tile(mask, (n_views, n_views))
    super_mask = jnp.tile(super_mask, (n_views, n_views))
    super_logits = super_mask * logits
    n = bsz * n_views
    logits_mask = 1.0 - jnp.eye(n, dtype=jnp.float32)
    mask = mask * logits_mask
    super_mask = super_mask * logits_mask
    neg_mask = logits_mask - super_mask
    exp_logits_super = jnp.exp(logits) * super_mask
    exp_logits = jnp.exp(logits) * neg_mask
    pos_matrix = jnp.exp((mask * logits).sum())
    neg_log = jnp.log(exp_logits_super.sum(1, keepdims=True))
    n_count = bsz * 2 - 2
    imp = jnp.exp(beta * neg_log)
    reweight_neg = (imp * super_logits).sum(-1) / imp.mean(-1)
    ng = (-tau_plus * n_count * pos_matrix + reweight_neg) / (1 - tau_plus)
    ng = jnp.maximum(ng, n_count * np.e ** (-1 / temperature))
    log_prob = logits - ng - jnp.log(exp_logits.sum(1, keepdims=True))
    mean_log_prob_pos = (mask * log_prob).sum(1) / mask.sum(1)
    loss = -(temperature / temperature) * mean_log_prob_pos
    return loss.reshape(n_views, bsz).mean()


if __name__ == "__main__":
    key = jax.random.PRNGKey(0)
    k1, k2 = jax.random.split(key)

    # ---- test 1: tiny, single row tile ----
    bsz, n_views, dim = 8, 2, 32
    features = jax.random.normal(k1, (bsz, n_views, dim), dtype=jnp.float32)
    features = features / jnp.linalg.norm(features, axis=-1, keepdims=True)
    labels = jnp.array([0, 1, 2, 3, 0, 1, 2, 3], dtype=jnp.int32)
    super_labels = jnp.array([0, 0, 1, 1, 0, 0, 1, 1], dtype=jnp.int32)

    loss = jax.block_until_ready(
        supcon_superclass_distance_loss(features, labels, super_labels))
    ref = _reference_loss(features, labels, super_labels)
    assert bool(jnp.isfinite(loss))
    np.testing.assert_allclose(np.asarray(loss), np.asarray(ref), rtol=5e-3, atol=5e-3)

    # ---- test 2: multi-tile grid, exercises row padding / cross-tile scratch ----
    bsz2, nv2, dim2 = 136, 2, 72                 # N = 272 -> TM = 256, Np = 512, 2 tiles
    f2 = jax.random.normal(k2, (bsz2, nv2, dim2), dtype=jnp.float32)
    f2 = f2 / jnp.linalg.norm(f2, axis=-1, keepdims=True)
    lab2 = jnp.arange(bsz2, dtype=jnp.int32) % 7
    slab2 = lab2 % 3

    loss2 = jax.block_until_ready(
        supcon_superclass_distance_loss(f2, lab2, slab2))
    ref2 = _reference_loss(f2, lab2, slab2)
    assert bool(jnp.isfinite(loss2))
    np.testing.assert_allclose(np.asarray(loss2), np.asarray(ref2), rtol=5e-3, atol=5e-3)

    print("KERNEL_OK")
</pallas_src>

<mosaic_0001>
module attributes {stable_mosaic.version = 11 : i64} {
  func.func @_supcon_kernel(%arg0: i32, %arg1: memref<16x128xf32, #tpu.memory_space<vmem>>, %arg2: memref<16x1xi32, #tpu.memory_space<vmem>>, %arg3: memref<16x1xi32, #tpu.memory_space<vmem>>, %arg4: memref<1x16xi32, #tpu.memory_space<vmem>>, %arg5: memref<1x16xi32, #tpu.memory_space<vmem>>, %arg6: memref<1x1xf32, #tpu.memory_space<vmem>>, %arg7: memref<1x1xf32, #tpu.memory_space<vmem>>, %arg8: memref<1x1xf32, #tpu.memory_space<vmem>>, %arg9: memref<1x16xf32, #tpu.memory_space<vmem>>, %arg10: memref<16x1xf32, #tpu.memory_space<vmem>>) attributes {dimension_semantics = [#tpu.dimension_semantics<arbitrary>], iteration_bounds = array<i64: 1>, scalar_prefetch = 0 : i64, scratch_operands = 4 : i64, tpu.core_type = #tpu.core_type<tc>, window_params = [{pipeline_mode = #tpu.pipeline_mode<synchronous>, transform_indices = @transform_0, window_bounds = array<i64: 16, 128>}, {transform_indices = @transform_1, window_bounds = array<i64: 16, 1>}, {transform_indices = @transform_2, window_bounds = array<i64: 16, 1>}, {pipeline_mode = #tpu.pipeline_mode<synchronous>, transform_indices = @transform_3, window_bounds = array<i64: 1, 16>}, {pipeline_mode = #tpu.pipeline_mode<synchronous>, transform_indices = @transform_4, window_bounds = array<i64: 1, 16>}, {pipeline_mode = #tpu.pipeline_mode<synchronous>, transform_indices = @transform_5, window_bounds = array<i64: 1, 1>}]} {
    %c0_i32 = arith.constant 0 : i32
    %0 = arith.cmpi eq, %arg0, %c0_i32 : i32
    %1 = arith.extui %0 : i1 to i32
    %c0_i32_0 = arith.constant 0 : i32
    %2 = arith.cmpi ne, %1, %c0_i32_0 : i32
    scf.if %2 {
      %cst_42 = arith.constant 0.000000e+00 : f32
      %101 = vector.broadcast %cst_42 : f32 to vector<1x1xf32>
      %c0_43 = arith.constant 0 : index
      %c0_44 = arith.constant 0 : index
      %102 = vector.load %arg7[%c0_43, %c0_44] : memref<1x1xf32, #tpu.memory_space<vmem>>, vector<1x1xf32>
      tpu.vector_store %arg7[%c0_43, %c0_44], %101 {strides = array<i32>} : memref<1x1xf32, #tpu.memory_space<vmem>>, vector<1x1xf32>,
      %cst_45 = arith.constant 0.000000e+00 : f32
      %103 = vector.broadcast %cst_45 : f32 to vector<1x1xf32>
      %c0_46 = arith.constant 0 : index
      %c0_47 = arith.constant 0 : index
      %104 = vector.load %arg8[%c0_46, %c0_47] : memref<1x1xf32, #tpu.memory_space<vmem>>, vector<1x1xf32>
      tpu.vector_store %arg8[%c0_46, %c0_47], %103 {strides = array<i32>} : memref<1x1xf32, #tpu.memory_space<vmem>>, vector<1x1xf32>,
      %cst_48 = arith.constant 0.000000e+00 : f32
      %105 = vector.broadcast %cst_48 : f32 to vector<1x16xf32>
      %c0_49 = arith.constant 0 : index
      %c0_50 = arith.constant 0 : index
      %106 = vector.load %arg9[%c0_49, %c0_50] : memref<1x16xf32, #tpu.memory_space<vmem>>, vector<1x16xf32>
      tpu.vector_store %arg9[%c0_49, %c0_50], %105 {strides = array<i32>} : memref<1x16xf32, #tpu.memory_space<vmem>>, vector<1x16xf32>,
    } else {
    }
    %c16_i32 = arith.constant 16 : i32
    %3 = arith.muli %arg0, %c16_i32 : i32
    %4 = tpu.assume_multiple %3, 16 : i32
    %c0 = arith.constant 0 : index
    %c0_1 = arith.constant 0 : index
    %5 = vector.load %arg1[%c0, %c0_1] : memref<16x128xf32, #tpu.memory_space<vmem>>, vector<16x128xf32>
    %6 = arith.index_cast %4 : i32 to index
    %c0_2 = arith.constant 0 : index
    %7 = vector.load %arg1[%6, %c0_2] : memref<16x128xf32, #tpu.memory_space<vmem>>, vector<16x128xf32>
    %cst = arith.constant dense<0.000000e+00> : vector<16x16xf32>
    %8 = tpu.matmul %7, %5, %cst {dimension_numbers = #tpu.dot_dimension_numbers<[1], [1], [0], [0], [0, 0, 1, 0], [], []>} : vector<16x128xf32>, vector<16x128xf32>, vector<16x16xf32> -> vector<16x16xf32>
    %cst_3 = arith.constant 7.000000e-02 : f32
    %9 = vector.broadcast %cst_3 : f32 to vector<16x16xf32>
    %10 = arith.divf %8, %9 : vector<16x16xf32>
    %11 = tpu.iota {dimensions = array<i32: 1>} : vector<16x16xi32>
    %12 = tpu.iota {dimensions = array<i32: 0>} : vector<16x16xi32>
    %13 = vector.broadcast %4 : i32 to vector<16x16xi32>
    %14 = arith.addi %13, %12 : vector<16x16xi32>
    %c16_i32_4 = arith.constant 16 : i32
    %15 = vector.broadcast %c16_i32_4 : i32 to vector<16x16xi32>
    %16 = arith.cmpi slt, %11, %15 : vector<16x16xi32>
    %17 = tpu.iota {dimensions = array<i32: 0>} : vector<16x1xi32>
    %18 = vector.broadcast %4 : i32 to vector<16x1xi32>
    %19 = arith.addi %18, %17 : vector<16x1xi32>
    %c16_i32_5 = arith.constant 16 : i32
    %20 = vector.broadcast %c16_i32_5 : i32 to vector<16x1xi32>
    %21 = arith.cmpi slt, %19, %20 : vector<16x1xi32>
    %22 = arith.extui %21 : vector<16x1xi1> to vector<16x1xi32>
    %23 = arith.sitofp %22 : vector<16x1xi32> to vector<16x1xf32>
    %cst_6 = arith.constant -1.000000e+30 : f32
    %24 = vector.broadcast %cst_6 : f32 to vector<16x16xf32>
    %25 = arith.select %16, %10, %24 : vector<16x16xi1>, vector<16x16xf32>
    %cst_7 = arith.constant dense<0xFF800000> : vector<16xf32>
    %26 = vector.multi_reduction <maximumf>, %25, %cst_7 [1] : vector<16x16xf32> to vector<16xf32>
    %27 = vector.shape_cast %26 : vector<16xf32> to vector<16x1xf32>
    %28 = vector.broadcast %27 : vector<16x1xf32> to vector<16x16xf32>
    %29 = arith.subf %10, %28 : vector<16x16xf32>
    %c0_8 = arith.constant 0 : index
    %c0_9 = arith.constant 0 : index
    %30 = vector.load %arg2[%c0_8, %c0_9] : memref<16x1xi32, #tpu.memory_space<vmem>>, vector<16x1xi32>
    %c0_10 = arith.constant 0 : index
    %c0_11 = arith.constant 0 : index
    %31 = vector.load %arg4[%c0_10, %c0_11] : memref<1x16xi32, #tpu.memory_space<vmem>>, vector<1x16xi32>
    %32 = vector.broadcast %30 : vector<16x1xi32> to vector<16x16xi32>
    %33 = vector.broadcast %31 : vector<1x16xi32> to vector<16x16xi32>
    %34 = arith.cmpi eq, %32, %33 : vector<16x16xi32>
    %c0_12 = arith.constant 0 : index
    %c0_13 = arith.constant 0 : index
    %35 = vector.load %arg3[%c0_12, %c0_13] : memref<16x1xi32, #tpu.memory_space<vmem>>, vector<16x1xi32>
    %c0_14 = arith.constant 0 : index
    %c0_15 = arith.constant 0 : index
    %36 = vector.load %arg5[%c0_14, %c0_15] : memref<1x16xi32, #tpu.memory_space<vmem>>, vector<1x16xi32>
    %37 = vector.broadcast %35 : vector<16x1xi32> to vector<16x16xi32>
    %38 = vector.broadcast %36 : vector<1x16xi32> to vector<16x16xi32>
    %39 = arith.cmpi eq, %37, %38 : vector<16x16xi32>
    %40 = arith.cmpi ne, %14, %11 : vector<16x16xi32>
    %41 = arith.andi %40, %16 : vector<16x16xi1>
    %42 = arith.andi %34, %41 : vector<16x16xi1>
    %43 = arith.extui %42 : vector<16x16xi1> to vector<16x16xi32>
    %44 = arith.sitofp %43 : vector<16x16xi32> to vector<16x16xf32>
    %45 = arith.andi %39, %16 : vector<16x16xi1>
    %46 = arith.extui %45 : vector<16x16xi1> to vector<16x16xi32>
    %47 = arith.sitofp %46 : vector<16x16xi32> to vector<16x16xf32>
    %48 = math.exp %29 : vector<16x16xf32>
    %cst_16 = arith.constant 0.000000e+00 : f32
    %49 = vector.broadcast %cst_16 : f32 to vector<16x16xf32>
    %50 = arith.select %41, %48, %49 : vector<16x16xi1>, vector<16x16xf32>
    %cst_17 = arith.constant 0.000000e+00 : f32
    %51 = vector.broadcast %cst_17 : f32 to vector<16x16xf32>
    %52 = arith.select %39, %51, %50 : vector<16x16xi1>, vector<16x16xf32>
    %53 = arith.mulf %44, %29 : vector<16x16xf32>
    %cst_18 = arith.constant dense<0.000000e+00> : vector<16xf32>
    %54 = vector.multi_reduction <add>, %53, %cst_18 [1] : vector<16x16xf32> to vector<16xf32>
    %55 = vector.shape_cast %54 : vector<16xf32> to vector<16x1xf32>
    %cst_19 = arith.constant dense<0.000000e+00> : vector<16xf32>
    %56 = vector.multi_reduction <add>, %44, %cst_19 [1] : vector<16x16xf32> to vector<16xf32>
    %57 = vector.shape_cast %56 : vector<16xf32> to vector<16x1xf32>
    %58 = arith.mulf %47, %29 : vector<16x16xf32>
    %cst_20 = arith.constant dense<0.000000e+00> : vector<16xf32>
    %59 = vector.multi_reduction <add>, %58, %cst_20 [1] : vector<16x16xf32> to vector<16xf32>
    %60 = vector.shape_cast %59 : vector<16xf32> to vector<16x1xf32>
    %cst_21 = arith.constant dense<0.000000e+00> : vector<16xf32>
    %61 = vector.multi_reduction <add>, %52, %cst_21 [1] : vector<16x16xf32> to vector<16xf32>
    %62 = vector.shape_cast %61 : vector<16xf32> to vector<16x1xf32>
    %cst_22 = arith.constant 1.000000e+00 : f32
    %63 = vector.broadcast %cst_22 : f32 to vector<16x1xf32>
    %64 = arith.select %21, %57, %63 : vector<16x1xi1>, vector<16x1xf32>
    %cst_23 = arith.constant 1.000000e+00 : f32
    %65 = vector.broadcast %cst_23 : f32 to vector<16x1xf32>
    %66 = arith.select %21, %62, %65 : vector<16x1xi1>, vector<16x1xf32>
    %67 = math.log %66 : vector<16x1xf32>
    %c0_24 = arith.constant 0 : index
    %c0_25 = arith.constant 0 : index
    %68 = vector.load %arg7[%c0_24, %c0_25] : memref<1x1xf32, #tpu.memory_space<vmem>>, vector<1x1xf32>
    %69 = arith.divf %55, %64 : vector<16x1xf32>
    %70 = arith.subf %69, %67 : vector<16x1xf32>
    %71 = arith.mulf %23, %70 : vector<16x1xf32>
    %72 = vector.shape_cast %71 : vector<16x1xf32> to vector<1x16x1xf32>
    %cst_26 = arith.constant dense<0.000000e+00> : vector<1xf32>
    %73 = vector.multi_reduction <add>, %72, %cst_26 [1, 2] : vector<1x16x1xf32> to vector<1xf32>
    %74 = vector.shape_cast %73 : vector<1xf32> to vector<1x1x1xf32>
    %75 = vector.extract %74[0, 0, 0] : f32 from vector<1x1x1xf32>
    %76 = vector.broadcast %75 : f32 to vector<1x1xf32>
    %77 = arith.addf %68, %76 : vector<1x1xf32>
    %c0_27 = arith.constant 0 : index
    %c0_28 = arith.constant 0 : index
    %78 = vector.load %arg7[%c0_27, %c0_28] : memref<1x1xf32, #tpu.memory_space<vmem>>, vector<1x1xf32>
    tpu.vector_store %arg7[%c0_27, %c0_28], %77 {strides = array<i32>} : memref<1x1xf32, #tpu.memory_space<vmem>>, vector<1x1xf32>,
    %c0_29 = arith.constant 0 : index
    %c0_30 = arith.constant 0 : index
    %79 = vector.load %arg8[%c0_29, %c0_30] : memref<1x1xf32, #tpu.memory_space<vmem>>, vector<1x1xf32>
    %80 = arith.mulf %23, %55 : vector<16x1xf32>
    %81 = vector.shape_cast %80 : vector<16x1xf32> to vector<1x16x1xf32>
    %cst_31 = arith.constant dense<0.000000e+00> : vector<1xf32>
    %82 = vector.multi_reduction <add>, %81, %cst_31 [1, 2] : vector<1x16x1xf32> to vector<1xf32>
    %83 = vector.shape_cast %82 : vector<1xf32> to vector<1x1x1xf32>
    %84 = vector.extract %83[0, 0, 0] : f32 from vector<1x1x1xf32>
    %85 = vector.broadcast %84 : f32 to vector<1x1xf32>
    %86 = arith.addf %79, %85 : vector<1x1xf32>
    %c0_32 = arith.constant 0 : index
    %c0_33 = arith.constant 0 : index
    %87 = vector.load %arg8[%c0_32, %c0_33] : memref<1x1xf32, #tpu.memory_space<vmem>>, vector<1x1xf32>
    tpu.vector_store %arg8[%c0_32, %c0_33], %86 {strides = array<i32>} : memref<1x1xf32, #tpu.memory_space<vmem>>, vector<1x1xf32>,
    %c0_34 = arith.constant 0 : index
    %c0_35 = arith.constant 0 : index
    %88 = vector.load %arg9[%c0_34, %c0_35] : memref<1x16xf32, #tpu.memory_space<vmem>>, vector<1x16xf32>
    %89 = arith.divf %23, %64 : vector<16x1xf32>
    %90 = vector.broadcast %89 : vector<16x1xf32> to vector<16x16xf32>
    %91 = arith.mulf %44, %90 : vector<16x16xf32>
    %cst_36 = arith.constant dense<0.000000e+00> : vector<16xf32>
    %92 = vector.multi_reduction <add>, %91, %cst_36 [0] : vector<16x16xf32> to vector<16xf32>
    %93 = vector.shape_cast %92 : vector<16xf32> to vector<1x16xf32>
    %94 = arith.addf %88, %93 : vector<1x16xf32>
    %c0_37 = arith.constant 0 : index
    %c0_38 = arith.constant 0 : index
    %95 = vector.load %arg9[%c0_37, %c0_38] : memref<1x16xf32, #tpu.memory_space<vmem>>, vector<1x16xf32>
    tpu.vector_store %arg9[%c0_37, %c0_38], %94 {strides = array<i32>} : memref<1x16xf32, #tpu.memory_space<vmem>>, vector<1x16xf32>,
    %96 = arith.index_cast %4 : i32 to index
    %c0_39 = arith.constant 0 : index
    %97 = vector.load %arg10[%96, %c0_39] : memref<16x1xf32, #tpu.memory_space<vmem>>, vector<16x1xf32>
    tpu.vector_store %arg10[%96, %c0_39], %60 {strides = array<i32>} : memref<16x1xf32, #tpu.memory_space<vmem>>, vector<16x1xf32>,
    %c0_i32_40 = arith.constant 0 : i32
    %98 = arith.cmpi eq, %arg0, %c0_i32_40 : i32
    %99 = arith.extui %98 : i1 to i32
    %c0_i32_41 = arith.constant 0 : i32
    %100 = arith.cmpi ne, %99, %c0_i32_41 : i32
    scf.if %100 {
      %c0_42 = arith.constant 0 : index
      %c0_43 = arith.constant 0 : index
      %101 = vector.load %arg8[%c0_42, %c0_43] : memref<1x1xf32, #tpu.memory_space<vmem>>, vector<1x1xf32>
      %102 = math.exp %101 : vector<1x1xf32>
      %c0_44 = arith.constant 0 : index
      %c0_45 = arith.constant 0 : index
      %103 = vector.load %arg10[%c0_44, %c0_45] : memref<16x1xf32, #tpu.memory_space<vmem>>, vector<16x1xf32>
      %cst_46 = arith.constant 1.400000e+00 : f32
      %104 = vector.broadcast %cst_46 : f32 to vector<1x1xf32>
      %105 = arith.mulf %104, %102 : vector<1x1xf32>
      %106 = vector.broadcast %105 : vector<1x1xf32> to vector<16x1xf32>
      %107 = arith.subf %103, %106 : vector<16x1xf32>
      %cst_47 = arith.constant 0.899999976 : f32
      %108 = vector.broadcast %cst_47 : f32 to vector<16x1xf32>
      %109 = arith.divf %107, %108 : vector<16x1xf32>
      %cst_48 = arith.constant 8.74824946E-6 : f32
      %110 = vector.broadcast %cst_48 : f32 to vector<16x1xf32>
      %111 = arith.maximumf %109, %110 : vector<16x1xf32>
      %c0_49 = arith.constant 0 : index
      %c0_50 = arith.constant 0 : index
      %112 = vector.load %arg9[%c0_49, %c0_50] : memref<1x16xf32, #tpu.memory_space<vmem>>, vector<1x16xf32>
      %cst_51 = arith.constant dense<0.000000e+00> : vector<1x1xf32>
      %113 = tpu.matmul %112, %111, %cst_51 {dimension_numbers = #tpu.dot_dimension_numbers<[1], [0], [0], [1], [0, 0, 1, 1], [], []>} : vector<1x16xf32>, vector<16x1xf32>, vector<1x1xf32> -> vector<1x1xf32>
      %c0_52 = arith.constant 0 : index
      %c0_53 = arith.constant 0 : index
      %114 = vector.load %arg7[%c0_52, %c0_53] : memref<1x1xf32, #tpu.memory_space<vmem>>, vector<1x1xf32>
      %115 = arith.subf %114, %113 : vector<1x1xf32>
      %cst_54 = arith.constant -6.250000e-02 : f32
      %116 = vector.broadcast %cst_54 : f32 to vector<1x1xf32>
      %117 = arith.mulf %116, %115 : vector<1x1xf32>
      %c0_55 = arith.constant 0 : index
      %c0_56 = arith.constant 0 : index
      %118 = vector.load %arg6[%c0_55, %c0_56] : memref<1x1xf32, #tpu.memory_space<vmem>>, vector<1x1xf32>
      tpu.vector_store %arg6[%c0_55, %c0_56], %117 {strides = array<i32>} : memref<1x1xf32, #tpu.memory_space<vmem>>, vector<1x1xf32>,
    } else {
    }
    return
  }
  func.func @transform_0(%arg0: i32) -> (i32, i32) {
    %c0_i32 = arith.constant 0 : i32
    %c0_i32_0 = arith.constant 0 : i32
    %c0_i32_1 = arith.constant 0 : i32
    return %c0_i32, %c0_i32_0 : i32, i32
  }
  func.func @transform_1(%arg0: i32) -> (i32, i32) {
    %c0_i32 = arith.constant 0 : i32
    %c0_i32_0 = arith.constant 0 : i32
    return %arg0, %c0_i32 : i32, i32
  }
  func.func @transform_2(%arg0: i32) -> (i32, i32) {
    %c0_i32 = arith.constant 0 : i32
    %c0_i32_0 = arith.constant 0 : i32
    return %arg0, %c0_i32 : i32, i32
  }
  func.func @transform_3(%arg0: i32) -> (i32, i32) {
    %c0_i32 = arith.constant 0 : i32
    %c0_i32_0 = arith.constant 0 : i32
    %c0_i32_1 = arith.constant 0 : i32
    return %c0_i32, %c0_i32_0 : i32, i32
  }
  func.func @transform_4(%arg0: i32) -> (i32, i32) {
    %c0_i32 = arith.constant 0 : i32
    %c0_i32_0 = arith.constant 0 : i32
    %c0_i32_1 = arith.constant 0 : i32
    return %c0_i32, %c0_i32_0 : i32, i32
  }
  func.func @transform_5(%arg0: i32) -> (i32, i32) {
    %c0_i32 = arith.constant 0 : i32
    %c0_i32_0 = arith.constant 0 : i32
    %c0_i32_1 = arith.constant 0 : i32
    return %c0_i32, %c0_i32_0 : i32, i32
  }
}

</mosaic_0001>

<bundles_post_ra>
// kernel: tpu_custom_call.1
= control target key start
LH: loop header
LB: loop body
LE: loop exit
PB: predicated region body
PF: predicated region fallthrough
CT: control target
= control target key end

     0   :  { %v492_v4 = vmov 0   ;;  %s652_s0 = inlined_call_operand.vmem [shape: f32[16,128], index: 0, kind: input, shape index: {}]   ;;  %s653_s1 = inlined_call_operand.vmem [shape: s32[16,1], index: 1, kind: input, shape index: {}]   ;;  %s654_s2 = inlined_call_operand.vmem [shape: s32[16,1], index: 2, kind: input, shape index: {}]   ;;  %s655_s3 = inlined_call_operand.vmem [shape: s32[1,16], index: 3, kind: input, shape index: {}]   ;;  %s656_s4 = inlined_call_operand.vmem [shape: s32[1,16], index: 4, kind: input, shape index: {}]   ;;  %s657_s5 = inlined_call_operand.hbm [shape: f32[1,1], index: 5, kind: output, shape index: {}]  }
   0x1   :  { %v31_v0 = vld [vmem:[%s652_s0] sm:$0xff]  ;;  %v32_v1 = vld [vmem:[%s652_s0 + $0x8] sm:$0xff]  ;;  %452 = vset.pattern.permute.xlu1 %v492_v4  ;;  %453 = vset.pattern.permute.xlu0 %v492_v4 }
   0x2   :  { %v140_v2 = vld [vmem:[%s653_s1] sm:$0xff]  ;;  %v436_v3 = vpack.c.bf16 %v32_v1, %v31_v0  ;;  %426 = vmatprep.mubr.f32.mxu0 %v31_v0 }
   0x3   :  { %144 = vperm.xlu1 %452, %v140_v2  }
   0x4   :  { %10 = vsyncpa [#allocation7], 0  ;;  %437 = vmatprep.subr.bf16.mxu0 %v436_v3  ;;  %v141_v5 = vld [vmem:[%s653_s1 + $0x8] sm:$0xff]  ;;  %v114_v7 = vlaneseq  ;;  %v408_v11 = vld [vmem:[%s655_s3] ss:$0 sm:$0xff]  ;;  %vm131_vm5 = vcmask 130048  }
   0x5   :  { %439 = vmatpush3.bf16.xpose.msra.mxu0 %v436_v3  ;;  %v156_v6 = vld [vmem:[%s654_s2 + $0x8] sm:$0xff]  ;;  %v493_v14 = vmov 0.0   ;;  %vm28_vm10 = vcmask 122880   ;;  %v155_v29 = vld [vmem:[%s654_s2] sm:$0xff]  ;;  %vm239_vm14 = vcmask 7168   ;;  %s496_s6 = smov [#allocation6]  }
   0x6   :  { %v542_v8 = vand.u32 127, %v114_v7  ;;  %v544_v9 = vshrl.u32 %v114_v7, 7  ;;  %29 = vst.msk [vmem:[#allocation4] sm:$0x1] %vm28_vm10, %v493_v14  ;;  %v409_v54 = vld [vmem:[%s656_s4] ss:$0 sm:$0xff] }
   0x7   :  { %147 = vperm.xlu1 %452, %v141_v5   ;;  %s400_s7 = sshll.u32 %s496_s6, 4  ;;  %s401_s7 = int_to_ptr.vmem [resolvable:$true] %s400_s7 }
   0x8   :  { %vm122_vm0 = vcmp.lt.s32.totalorder %v542_v8, 16  ;;  %vm170_vm1 = vcmp.ne.s32.totalorder %v544_v9, %v542_v8  ;;  %v118_v10 = vadd.s32 8, %v544_v9  ;;  %s468_s8 = scalar_lea.vmem %s401_s7, 16  ;;  %s472_s9 = scalar_lea.vmem %s401_s7, 32 }
   0x9   :  { %vm555_vm2 = vmand %vm170_vm1, %vm122_vm0  ;;  %vm25_vm1 = vcmask 0   ;;  %p469_p0 = scmp.ne.s32.totalorder %s401_s7, %s468_s8  ;;  %p473_p1 = scmp.lt.s32.totalorder %s401_s7, %s401_s7 }
   0xa   :  { %vm171_vm3 = vcmp.ne.s32.totalorder %v118_v10, %v542_v8  ;;  %26 = vst.msk [vmem:[#allocation2] sm:$0x1] %vm25_vm1, %v493_v14  ;;  %27 = vst.msk [vmem:[#allocation3] sm:$0x1] %vm25_vm1, %v493_v14  ;;  %v494_v8 = vmov 0.0|0.0   ;;  %p474_p2 = scmp.lt.s32.totalorder %s472_s9, %s468_s8 }
   0xb   :  { %162 = vperm.xlu1 %452, %v156_v6   ;;  %vm567_vm7 = vmand %vm171_vm3, %vm122_vm0  ;;  %440 = vmatprep.subr.bf16.mxu1 %v494_v8 }
   0xc   :  { %427 = vmatmul.mubr.f32.vlgmr.msra.gmra.mrb[0].mxu0 %v32_v1  ;;  %p475_p3 = por %p474_p2, %p473_p1 }
   0xd   :  { %v274_v45 = vld [vmem:[#allocation4] sm:$0x1] }
   0xe   :  { %p476_p4 = pnand %p475_p3, %p469_p0 }
  0x82   :  { %v145_v13 = vpop.permute.xlu1 %144 }
  0x83   :  { %vm153_vm4 = vcmp.eq.s32.totalorder %v145_v13, %v408_v11 }
  0x84   :  { %vm174_vm6 = vmand %vm153_vm4, %vm555_vm2 }
  0x85   :  { %v563_v15 = vsel %vm174_vm6, 1.0, %v493_v14 }
  0x86   :  { %v148_v17 = vpop.permute.xlu1 %147  ;;  %v202_v18 = vsel %vm131_vm5, %v563_v15, 0.0 }
  0x87   :  { %vm154_vm8 = vcmp.eq.s32.totalorder %v148_v17, %v408_v11  ;;  %203 = vadd.xlane.f32.xlu1 %v202_v18 }
  0x88   :  { %vm175_vm9 = vmand %vm154_vm8, %vm567_vm7 }
  0x89   :  { %v576_v19 = vsel %vm175_vm9, 1.0, %v493_v14 }
  0x8a   :  { %v205_v20 = vsel %vm131_vm5, %v576_v19, 0.0  ;;  %v591_v30 = vpop.permute.xlu1 %162 }
  0x8b   :  { %206 = vadd.xlane.f32.xlu1 %v205_v20  ;;  %vm169_vm13 = vcmp.eq.s32.totalorder %v591_v30, %v409_v54 }
  0x8c   :  { %vm181_vm15 = vmand %vm169_vm13, %vm122_vm0 }
  0xdf   :  { %v428_v21 = vpop.f32.mrb[0].mxu0 }
  0xe0   :  { %v113_v22 = vmul.f32 14.285714, %v428_v21  ;;  %v102_v23 = vpop.f32.mrb[1].mxu0 }
  0xe1   :  { %v112_v24 = vmul.f32 14.285714, %v102_v23 }
  0xe2   :  { %v130_v25 = vsel %vm122_vm0, %v113_v22, -1e+30 }
  0xe3   :  { %v135_v26 = vsel %vm131_vm5, %v130_v25, -inf  ;;  %v129_v27 = vsel %vm122_vm0, %v112_v24, -1e+30 }
  0xe4   :  { %136 = vmax.xlane.f32.xlu0 %v135_v26  ;;  %v132_v28 = vsel %vm131_vm5, %v129_v27, -inf  ;;  %v413_v27 = vsel %vm181_vm15, 1.0, %v493_v14 }
  0xe8   :  { %133 = vmax.xlane.f32.xlu0 %v132_v28 }
  0xfe   :  { %159 = vperm.xlu0 %453, %v155_v29  }
 0x114   :  { %v204_v31 = vpop.xlane.xlu1 %203 }
 0x115   :  { %454 = vrcp.f32 %v204_v31 }
 0x118   :  { %v207_v32 = vpop.xlane.xlu1 %206 }
 0x119   :  { %456 = vrcp.f32 %v207_v32 }
 0x11f   :  { %v455_v33 = vpop.eup %454 }
 0x120   :  { %v277_v34 = vmul.f32 %v455_v33, %v563_v15 }
 0x122   :  { %v279_v36 = vsel %vm131_vm5, %v277_v34, 0.0 }
 0x123   :  { %v457_v35 = vpop.eup %456 }
 0x124   :  { %v278_v37 = vmul.f32 %v457_v35, %v576_v19 }
 0x126   :  { %v280_v38 = vsel %vm131_vm5, %v278_v37, 0.0 }
 0x127   :  { %v281_v39 = vadd.f32 %v280_v38, %v279_v36 }
 0x129   :  { %v282_v40 = vrot.slane %v281_v39, 4 }
 0x12b   :  { %v283_v41 = vadd.f32 %v282_v40, %v281_v39 }
 0x12d   :  { %v284_v42 = vrot.slane %v283_v41, 2 }
 0x12f   :  { %v285_v43 = vadd.f32 %v284_v42, %v283_v41 }
 0x131   :  { %v286_v44 = vrot.slane %v285_v43, 1 }
 0x133   :  { %v287_v46 = vadd.f32 %v286_v44, %v285_v43 }
 0x135   :  { %v288_v47 = vadd.f32 %v287_v46, %v274_v45  ;;  %v230_v46 = vld [vmem:[#allocation2] sm:$0x1] }
 0x137   :  { %290 = vst.msk [vmem:[#allocation4] sm:$0x1] %vm28_vm10, %v288_v47 }
 0x171   :  { %v137_v48 = vpop.xlane.xlu0 %136 }
 0x172   :  { %v139_v49 = vsub.f32 %v113_v22, %v137_v48 }
 0x174   :  { %v188_v50 = vmul.f32 1.442695, %v139_v49  ;;  %v195_v4 = vmul.f32 %v576_v19, %v139_v49  ;;  %v209_v29 = vmul.f32 %v413_v27, %v139_v49  ;;  %v256_v49 = vld [vmem:[#allocation3] sm:$0x1] }
 0x175   :  { %v134_v51 = vpop.xlane.xlu0 %133 }
 0x176   :  { %458 = vpow2.f32 %v188_v50  ;;  %v138_v52 = vsub.f32 %v112_v24, %v134_v51  ;;  %v199_v5 = vsel %vm131_vm5, %v195_v4, 0.0  ;;  %v213_v31 = vsel %vm131_vm5, %v209_v29, 0.0 }
 0x178   :  { %v186_v53 = vmul.f32 1.442695, %v138_v52  ;;  %v194_v62 = vmul.f32 %v563_v15, %v138_v52 }
 0x17a   :  { %460 = vpow2.f32 %v186_v53  ;;  %v196_v3 = vsel %vm131_vm5, %v194_v62, 0.0 }
 0x17d   :  { %v160_v55 = vpop.permute.xlu0 %159 }
 0x17e   :  { %vm168_vm11 = vcmp.eq.s32.totalorder %v160_v55, %v409_v54  ;;  %v306_v54 = vsub.s32 0, %v544_v9 }
 0x17f   :  { %vm180_vm12 = vmand %vm168_vm11, %vm122_vm0  ;;  %vm495_vm0 = vmmov 0  }
 0x180   :  { %v459_v56 = vpop.eup %458  ;;  %v412_v57 = vsel %vm180_vm12, 1.0, %v493_v14  ;;  %433 = vmatprep.mubr.msk.f32.mxu1 %vm495_vm0, %v493_v14 }
 0x181   :  { %v191_v58 = vsel %vm567_vm7, %v459_v56, 0.0  ;;  %v208_v59 = vmul.f32 %v412_v57, %v138_v52 }
 0x182   :  { %v193_v60 = vsel %vm169_vm13, 0.0, %v191_v58 }
 0x183   :  { %v219_v61 = vsel %vm131_vm5, %v193_v60, 0.0  ;;  %v210_v28 = vsel %vm131_vm5, %v208_v59, 0.0 }
 0x184   :  { %v461_v63 = vpop.eup %460  ;;  %220 = vadd.xlane.f32.xlu1 %v219_v61 }
 0x185   :  { %v190_v0 = vsel %vm555_vm2, %v461_v63, 0.0 }
 0x186   :  { %v192_v1 = vsel %vm168_vm11, 0.0, %v190_v0 }
 0x187   :  { %v216_v2 = vsel %vm131_vm5, %v192_v1, 0.0 }
 0x188   :  { %217 = vadd.xlane.f32.xlu0 %v216_v2  ;;  %197 = vadd.xlane.f32.xlu1 %v196_v3  ;;  %v316_v3 = vld [vmem:[#allocation4] sm:$0x1] }
 0x18c   :  { %200 = vadd.xlane.f32.xlu1 %v199_v5 }
 0x211   :  { %v221_v6 = vpop.xlane.xlu1 %220 }
 0x212   :  { %462 = vlog2.f32 %v221_v6 }
 0x215   :  { %v218_v7 = vpop.xlane.xlu0 %217  ;;  %v198_v10 = vpop.xlane.xlu1 %197 }
 0x216   :  { %464 = vlog2.f32 %v218_v7  ;;  %v232_v18 = vmul.f32 %v455_v33, %v198_v10  ;;  %v259_v25 = vsel %vm239_vm14, %v198_v10, 0.0 }
 0x219   :  { %v201_v12 = vpop.xlane.xlu1 %200 }
 0x21a   :  { %v234_v15 = vmul.f32 %v457_v35, %v201_v12  ;;  %v260_v24 = vsel %vm239_vm14, %v201_v12, 0.0 }
 0x21b   :  { %v261_v26 = vadd.f32 %v260_v24, %v259_v25 }
 0x21c   :  { %v463_v11 = vpop.eup %462 }
 0x21d   :  { %v229_v13 = vmul.f32 0.6931472, %v463_v11 }
 0x21f   :  { %v236_v20 = vsub.f32 %v234_v15, %v229_v13 }
 0x220   :  { %v465_v16 = vpop.eup %464 }
 0x221   :  { %v227_v17 = vmul.f32 0.6931472, %v465_v16  ;;  %v241_v22 = vsel %vm239_vm14, %v236_v20, 0.0 }
 0x223   :  { %v235_v21 = vsub.f32 %v232_v18, %v227_v17 }
 0x225   :  { %v240_v19 = vsel %vm239_vm14, %v235_v21, 0.0 }
 0x226   :  { %v242_v23 = vadd.f32 %v241_v22, %v240_v19 }
 0x228   :  { %243 = vadd.xlane.f32.xlu1 %v242_v23 }
 0x22c   :  { %262 = vadd.xlane.f32.xlu1 %v261_v26 }
 0x230   :  { %211 = vadd.xlane.f32.xlu1 %v210_v28 }
 0x234   :  { %214 = vadd.xlane.f32.xlu1 %v213_v31 }
 0x2b5   :  { %v244_v30 = vpop.xlane.xlu1 %243 }
 0x2b6   :  { %v245_v32 = vrot.slane %v244_v30, 4 }
 0x2b8   :  { %v246_v33 = vadd.f32 %v245_v32, %v244_v30 }
 0x2b9   :  { %v263_v34 = vpop.xlane.xlu1 %262 }
 0x2ba   :  { %v247_v35 = vrot.slane %v246_v33, 2  ;;  %v264_v36 = vrot.slane %v263_v34, 4 }
 0x2bc   :  { %v265_v37 = vadd.f32 %v264_v36, %v263_v34  ;;  %v248_v38 = vadd.f32 %v247_v35, %v246_v33 }
 0x2bd   :  { %v212_v39 = vpop.xlane.xlu1 %211 }
 0x2be   :  { %v266_v40 = vrot.slane %v265_v37, 2  ;;  %292 = vst.msk [vmem:[#allocation5] sm:$0xff] %vm239_vm14, %v212_v39  ;;  %v249_v41 = vrot.slane %v248_v38, 1 }
 0x2c0   :  { %v250_v42 = vadd.f32 %v249_v41, %v248_v38  ;;  %v267_v43 = vadd.f32 %v266_v40, %v265_v37 }
 0x2c1   :  { %v215_v44 = vpop.xlane.xlu1 %214 }
 0x2c2   :  { %293 = vst.msk [vmem:[#allocation5 + $0x8] sm:$0xff] %vm239_vm14, %v215_v44  ;;  %v268_v14 = vrot.slane %v267_v43, 1 }
 0x2c3   :  { %443 = vpush %v250_v42 }
 0x2c4   :  { %v269_v45 = vadd.f32 %v268_v14, %v267_v43 }
 0x2c5   :  { %v300_v58 = vld [vmem:[#allocation5] sm:$0xff] }
 0x2c6   :  { %445 = vpush %v269_v45 }
 0x2c9   :  { %v301_v59 = vld [vmem:[#allocation5 + $0x8] sm:$0xff] }
 0x2f4   :  { %s444_s4 = spop %443 }
 0x2f5   :  { %v252_v47 = vstv %s444_s4 }
 0x2f6   :  { %v253_v48 = vadd.f32 %v252_v47, %v230_v46 }
 0x2f7   :  { %s446_s30 = spop %445 }
 0x2f8   :  { %255 = vst.msk [vmem:[#allocation2] sm:$0x1] %vm25_vm1, %v253_v48  ;;  %v271_v50 = vstv %s446_s30 }
 0x2f9   :  { %v272_v51 = vadd.f32 %v271_v50, %v256_v49 }
 0x2fb   :  { %273 = vst.msk [vmem:[#allocation3] sm:$0x1] %vm25_vm1, %v272_v51 }
 0x2ff   :  { %v390_v5 = vld [vmem:[#allocation2] sm:$0x1] }
 0x302   :  { %v297_v52 = vld [vmem:[#allocation3] sm:$0x1] }
 0x303   :  { %v298_v53 = vmul.f32 1.442695, %v297_v52 }
 0x305   :  { %466 = vpow2.f32 %v298_v53 }
 0x30f   :  { %v467_v55 = vpop.eup %466 }
 0x310   :  { %v302_v56 = vmul.f32 1.4, %v467_v55 }
 0x312   :  { %v307_v57 = vrot.slane %v302_v56, %v306_v54 }
 0x314   :  { %v309_v60 = vsub.f32 %v300_v58, %v307_v57  ;;  %v310_v61 = vsub.f32 %v301_v59, %v307_v57 }
 0x316   :  { %v312_v62 = vmul.f32 1.1111112, %v309_v60  ;;  %v313_v63 = vmul.f32 1.1111112, %v310_v61 }
 0x318   :  { %v314_v0 = vmax.f32 %v312_v62, 8.7482495e-06  ;;  %v315_v1 = vmax.f32 %v313_v63, 8.7482495e-06 }
 0x31a   :  { %v441_v2 = vpack.c.bf16 %v315_v1, %v314_v0 }
 0x31c   :  { %442 = vmatpush3.bf16.msra.mxu1 %v441_v2 }
 0x31f   :  { %434 = vmatmul.mubr.msk.f32.vlgmr.msra.gmra.mrb[0].mxu1 %vm131_vm5, %v316_v3 }
 0x3f2   :  { %v386_v4 = vpop.f32.mrb[0].mxu1 }
 0x3f3   :  { %v391_v9 = vsub.f32 %v390_v5, %v386_v4  ;;  %v435_v6 = vpop.f32.mrb[1].mxu1 }
 0x3f5   :  { %v392_v7 = vmul.f32 -0.0625, %v391_v9 }
 0x3f7   :  { %393 = vst.msk [vmem:[#allocation6] sm:$0x1] %vm25_vm1, %v392_v7 }
 0x3f8   :  { %479 = shalt.err (!%p476_p4)
}
 0x3f9   :  { %s480_s12 = scalar_lea.hbm %s657_s5, 16 }
 0x3fa   :  { %p481_p5 = scmp.ne.s32.totalorder %s657_s5, %s480_s12  ;;  %p484_p6 = scmp.lt.u32.totalorder %s480_s12, %s657_s5 }
 0x3fc   :  { %p486_p7 = pnand %p484_p6, %p481_p5 }
 0x3fe   :  { %489 = shalt.err (!%p486_p7)
}
 0x3ff   :  { %403 = dma.vmem_to_hbm [thread:$0]  %s401_s7, 16, %s657_s5, [#allocation7]  }
 0x400   :  { %490 = dma.done.wait [#allocation7], 16  }
 0x401   :  { %491 = vsyncadd [#allocation7], 4294967280 }
 0x402   :  { %407 = vsyncpa [#allocation7], 1 }

</bundles_post_ra>
